<compile_context>
chip_gen: v6e
topology: v6e:2x2x1
jax: 0.10.0
libtpu: 0.0.40
codegen_flags: <defaults>
</compile_context>

<pallas_src>
import jax
import jax.numpy as jnp
from jax.experimental import pallas as pl
from jax.experimental.pallas import tpu as pltpu

_LANES = 128
_SMALL_BYTES = 1 << 20   # below this: one full-array block (no tiling overhead)
_MIN_BLOCKS = 4          # above it: at least 4 blocks for megacore + pipelining


def _srelu_kernel(x_ref, o_ref):
    x = x_ref[...]
    r = jnp.maximum(x, jnp.zeros_like(x))   # relu
    o_ref[...] = r * r                      # square


def srelu(x: jax.Array, *, target_block_bytes: int = 4 << 20) -> jax.Array:
    """Elementwise square(relu(x)) for any shape/dtype, computed in Pallas."""
    orig_shape = x.shape
    dtype = x.dtype
    total = x.size
    if total == 0:
        return x

    itemsize = jnp.dtype(dtype).itemsize
    # Native sublane granularity per dtype width (packed sublanes for <32-bit).
    sub = {4: 8, 2: 16, 1: 32}.get(itemsize, 8)

    # Rows needed to hold all elements at 128 lanes -- no block-multiple rounding,
    # so padding only happens when the element count is not lane-aligned.
    rows = -(-total // _LANES)              # cdiv
    padded_total = rows * _LANES

    total_bytes = total * itemsize
    if total_bytes <= _SMALL_BYTES:
        # Single block equal to the full (rows, 128) array: always a legal
        # block shape regardless of sublane alignment, minimal overhead.
        block_rows = rows
        num_blocks = 1
    else:
        # Cap block size (~4 MiB) and guarantee >= _MIN_BLOCKS grid steps so
        # v7x can shard across both TensorCores and DMA overlaps compute.
        max_block_rows = max(sub, target_block_bytes // (_LANES * itemsize))
        max_block_rows -= max_block_rows % sub
        want = -(-rows // _MIN_BLOCKS)                      # cdiv
        want = ((want + sub - 1) // sub) * sub              # sublane-align
        block_rows = max(sub, min(max_block_rows, want))
        num_blocks = -(-rows // block_rows)                 # ragged tail is masked

    xf = jnp.ravel(x)
    padded = padded_total != total
    if padded:
        xf = jnp.pad(xf, (0, padded_total - total))
    x2d = xf.reshape(rows, _LANES)

    out2d = pl.pallas_call(
        _srelu_kernel,
        out_shape=jax.ShapeDtypeStruct((rows, _LANES), dtype),
        grid_spec=pltpu.PrefetchScalarGridSpec(
            num_scalar_prefetch=0,
            grid=(num_blocks,),
            in_specs=[pl.BlockSpec((block_rows, _LANES), lambda i: (i, 0))],
            out_specs=pl.BlockSpec((block_rows, _LANES), lambda i: (i, 0)),
        ),
        compiler_params=pltpu.CompilerParams(
            dimension_semantics=("parallel",),
            vmem_limit_bytes=32 << 20,   # 4 MiB blocks x 2 bufs x (in+out) = 16 MiB
        ),
        cost_estimate=pl.CostEstimate(
            flops=2 * total,
            transcendentals=0,
            bytes_accessed=2 * total * itemsize,
        ),
    )(x2d)

    out = out2d.reshape(-1)
    if padded:
        out = out[:total]
    return out.reshape(orig_shape)


if __name__ == "__main__":
    key = jax.random.PRNGKey(0)

    # NCHW input, small shapes: batch=2, channels=4, spatial=16x16.
    x = jax.random.normal(key, (2, 4, 16, 16), dtype=jnp.float32)
    y = srelu(x)
    jax.block_until_ready(y)
    ref = jnp.square(jnp.maximum(x, 0.0))
    assert y.shape == x.shape and y.dtype == x.dtype
    assert jnp.allclose(y, ref, atol=1e-6, rtol=1e-6)

    # Non-128-divisible element count -> exercises the pad + slice path.
    x_odd = jax.random.normal(jax.random.PRNGKey(1), (3, 5, 7, 11), dtype=jnp.float32)
    y_odd = srelu(x_odd)
    jax.block_until_ready(y_odd)
    assert jnp.allclose(y_odd, jnp.square(jnp.maximum(x_odd, 0.0)), atol=1e-6, rtol=1e-6)

    # bf16 path (16-bit sublane alignment).
    x_bf16 = x.astype(jnp.bfloat16)
    y_bf16 = srelu(x_bf16)
    jax.block_until_ready(y_bf16)
    assert y_bf16.dtype == jnp.bfloat16
    assert jnp.allclose(
        y_bf16.astype(jnp.float32),
        jnp.square(jnp.maximum(x_bf16, 0)).astype(jnp.float32),
        atol=1e-2, rtol=1e-2,
    )

    # ~2 MiB input -> exercises the multi-block (>= 4 grid steps) tiled path.
    x_big = jax.random.normal(jax.random.PRNGKey(2), (8, 64, 32, 32), dtype=jnp.float32)
    y_big = srelu(x_big)
    jax.block_until_ready(y_big)
    assert jnp.allclose(y_big, jnp.square(jnp.maximum(x_big, 0.0)), atol=1e-6, rtol=1e-6)

    print("KERNEL_OK")
</pallas_src>

<mosaic_0001>
module attributes {stable_mosaic.version = 11 : i64} {
  func.func @_srelu_kernel(%arg0: i32, %arg1: memref<16x128xf32, #tpu.memory_space<vmem>>, %arg2: memref<16x128xf32, #tpu.memory_space<vmem>>) attributes {dimension_semantics = [#tpu.dimension_semantics<parallel>], iteration_bounds = array<i64: 1>, scalar_prefetch = 0 : i64, scratch_operands = 0 : i64, tpu.core_type = #tpu.core_type<tc>, window_params = [{transform_indices = @transform_0, window_bounds = array<i64: 16, 128>}, {transform_indices = @transform_1, window_bounds = array<i64: 16, 128>}]} {
    %c0 = arith.constant 0 : index
    %c0_0 = arith.constant 0 : index
    %0 = vector.load %arg1[%c0, %c0_0] : memref<16x128xf32, #tpu.memory_space<vmem>>, vector<16x128xf32>
    %cst = arith.constant 0.000000e+00 : f32
    %1 = vector.broadcast %cst : f32 to vector<16x128xf32>
    %2 = arith.maximumf %0, %1 : vector<16x128xf32>
    %3 = arith.mulf %2, %2 : vector<16x128xf32>
    %c0_1 = arith.constant 0 : index
    %c0_2 = arith.constant 0 : index
    %4 = vector.load %arg2[%c0_1, %c0_2] : memref<16x128xf32, #tpu.memory_space<vmem>>, vector<16x128xf32>
    tpu.vector_store %arg2[%c0_1, %c0_2], %3 {strides = array<i32>} : memref<16x128xf32, #tpu.memory_space<vmem>>, vector<16x128xf32>,
    return
  }
  func.func @transform_0(%arg0: i32) -> (i32, i32) {
    %c0_i32 = arith.constant 0 : i32
    %c0_i32_0 = arith.constant 0 : i32
    return %arg0, %c0_i32 : i32, i32
  }
  func.func @transform_1(%arg0: i32) -> (i32, i32) {
    %c0_i32 = arith.constant 0 : i32
    %c0_i32_0 = arith.constant 0 : i32
    return %arg0, %c0_i32 : i32, i32
  }
}

</mosaic_0001>

<bundles_post_ra>
// kernel: tpu_custom_call.1
= control target key start
LH: loop header
LB: loop body
LE: loop exit
PB: predicated region body
PF: predicated region fallthrough
CT: control target
= control target key end

     0   :  { %6 = vsyncpa [#allocation3], 0  ;;  %s116_s0 = inlined_call_operand.hbm [shape: f32[16,128], index: 0, kind: input, shape index: {}]   ;;  %s117_s1 = inlined_call_operand.hbm [shape: f32[16,128], index: 1, kind: output, shape index: {}]  }
   0x1   :  { %7 = vsyncpa [#allocation4], 0  ;;  %s96_s6 = smov [#allocation2]  }
   0x2   :  { %s13_s7 = sshll.u32 %s96_s6, 4  ;;  %s14_s7 = int_to_ptr.vmem [resolvable:$true] %s13_s7 }
   0x3   :  { %s60_s8 = scalar_lea.vmem %s14_s7, 256  ;;  %p65_p1 = scmp.lt.s32.totalorder %s14_s7, %s14_s7 }
   0x4   :  { %p61_p0 = scmp.ne.s32.totalorder %s14_s7, %s60_s8  ;;  %p66_p2 = scmp.lt.s32.totalorder %s60_s8, %s60_s8 }
   0x6   :  { %p67_p3 = por %p66_p2, %p65_p1 }
   0x8   :  { %p68_p4 = pnand %p67_p3, %p61_p0 }
   0xa   :  { %71 = shalt.err (!%p68_p4)
}
   0xb   :  { %s97_s9 = smov 128   ;;  %s98_s10 = smov 8  }
   0xc   :  { %19 = dma.hbm_to_vmem [thread:$0]  %s116_s0, 256, %s14_s7, [#allocation3], %s97_s9, %s97_s9, %s98_s10  }
   0xd   :  { %92 = dma.done.wait [#allocation3], 256  }
   0xe   :  { %93 = vsyncadd [#allocation3], 4294967040  ;;  %v23_v0 = vld [vmem:[#allocation2] sm:$0xff]  ;;  %v24_v1 = vld [vmem:[#allocation2 + $0x8] sm:$0xff]  ;;  %s99_s13 = smov [#allocation5]  }
   0xf   :  { %s36_s14 = sshll.u32 %s99_s13, 4  ;;  %v25_v2 = vmax.f32 %v23_v0, 0.0  ;;  %v26_v3 = vmax.f32 %v24_v1, 0.0  ;;  %s37_s14 = int_to_ptr.vmem [resolvable:$true] %s36_s14 }
  0x10   :  { %s72_s15 = scalar_lea.vmem %s37_s14, 256  ;;  %p77_p6 = scmp.lt.s32.totalorder %s37_s14, %s37_s14 }
  0x11   :  { %v27_v4 = vmul.f32 %v25_v2, %v25_v2  ;;  %v28_v5 = vmul.f32 %v26_v3, %v26_v3  ;;  %p73_p5 = scmp.ne.s32.totalorder %s37_s14, %s72_s15  ;;  %p78_p7 = scmp.lt.s32.totalorder %s72_s15, %s72_s15 }
  0x13   :  { %29 = vst [vmem:[#allocation5] sm:$0xff] %v27_v4  ;;  %30 = vst [vmem:[#allocation5 + $0x8] sm:$0xff] %v28_v5  ;;  %p79_p8 = por %p78_p7, %p77_p6 }
  0x15   :  { %p80_p9 = pnand %p79_p8, %p73_p5 }
  0x17   :  { %83 = shalt.err (!%p80_p9)
}
  0x18   :  { %42 = dma.vmem_to_hbm [thread:$0]  %s37_s14, 256, %s117_s1, [#allocation4], %s97_s9, %s97_s9, %s98_s10  }
  0x19   :  { %94 = dma.done.wait [#allocation4], 256  }
  0x1a   :  { %95 = vsyncadd [#allocation4], 4294967040 }
  0x1b   :  { %46 = vsyncpa [#allocation3], 1 }
  0x1c   :  { %47 = vsyncpa [#allocation4], 1 }

</bundles_post_ra>
